<compile_context>
chip_gen: v7x
topology: tpu7x:2x2x1
jax: 0.10.0
libtpu: 0.0.40
codegen_flags: <defaults>
</compile_context>

<pallas_src>
import jax
import jax.numpy as jnp
from jax.experimental import pallas as pl
from jax.experimental.pallas import tpu as pltpu


# --------------------------------------------------------------------------
# Kernel
# --------------------------------------------------------------------------
def make_rnd_kernel(n_hidden):
    """Kernel over one batch tile, transposed layout (features x batch)."""

    def kernel(xT_ref, *refs):
        param_refs = refs[:-1]          # [W0T, b0, W1T_bd, b1, ..., WlastT, b_diff]
        out_ref = refs[-1]              # (1, TB) f32

        h = xT_ref[...]                 # (ob_dim, TB), bf16 (or f32)
        for layer in range(n_hidden):
            w = param_refs[2 * layer][...]          # (2S, in) bf16
            b = param_refs[2 * layer + 1][...]      # (2S, 1)  f32
            z = jnp.dot(w, h.astype(w.dtype),
                        preferred_element_type=jnp.float32) + b
            h = jnp.tanh(z)                         # f32, (2S, TB)

        w = param_refs[-2][...]                     # (P, 2S) bf16, [fw2.T | -hw2.T]
        b = param_refs[-1][...]                     # (P, 1)  f32, fb2 - hb2
        diff = jnp.dot(w, h.astype(w.dtype),
                       preferred_element_type=jnp.float32) + b   # f(x)-f_hat(x), (P, TB)

        # per-row (per batch element) L2 norm -> lane-dense (1, TB) row
        out_ref[...] = jnp.sqrt(jnp.sum(diff * diff, axis=0, keepdims=True))

    return kernel


# --------------------------------------------------------------------------
# Parameter packing: fuse f and f_hat into a single MLP that outputs the diff
# --------------------------------------------------------------------------
def pack_rnd_params(f_params, fhat_params, dtype=jnp.bfloat16):
    """f_params/fhat_params: [W0, b0, ..., Wk, bk], W (in,out), b (1,out)."""
    n_hidden = len(f_params) // 2 - 1
    packed = []

    # first hidden layer: concatenate along output features
    fw, fb = f_params[0], f_params[1]
    hw, hb = fhat_params[0], fhat_params[1]
    w0 = jnp.concatenate([fw, hw], axis=1)                  # (in, 2S)
    b0 = jnp.concatenate([fb, hb], axis=1)                  # (1, 2S)
    packed.append(w0.T.astype(dtype))                       # (2S, in)
    packed.append(b0.T.astype(jnp.float32))                 # (2S, 1)

    # remaining hidden layers: block-diagonal
    for i in range(1, n_hidden):
        fw, fb = f_params[2 * i], f_params[2 * i + 1]
        hw, hb = fhat_params[2 * i], fhat_params[2 * i + 1]
        z = jnp.zeros_like(fw)
        wbd = jnp.concatenate(
            [jnp.concatenate([fw, z], axis=1),
             jnp.concatenate([z, hw], axis=1)], axis=0)     # (2S, 2S)
        bcat = jnp.concatenate([fb, hb], axis=1)            # (1, 2S)
        packed.append(wbd.T.astype(dtype))
        packed.append(bcat.T.astype(jnp.float32))

    # last layer: stacked with sign flip so the matmul yields f(x) - f_hat(x)
    fw, fb = f_params[-2], f_params[-1]
    hw, hb = fhat_params[-2], fhat_params[-1]
    wlast = jnp.concatenate([fw, -hw], axis=0)              # (2S, P)
    blast = fb - hb                                         # (1, P)
    packed.append(wlast.T.astype(dtype))                    # (P, 2S)
    packed.append(blast.T.astype(jnp.float32))              # (P, 1)
    return packed


# --------------------------------------------------------------------------
# Wrapper
# --------------------------------------------------------------------------
def rnd_forward(x, f_params, fhat_params, *, batch_tile=1024, use_bf16=True):
    """x: (N, ob_dim) float32. Returns error of shape (N,) float32."""
    N, ob_dim = x.shape
    compute_dtype = jnp.bfloat16 if use_bf16 else jnp.float32
    n_hidden = len(f_params) // 2 - 1

    packed = pack_rnd_params(f_params, fhat_params, dtype=compute_dtype)

    # Batch tiling: lane-aligned tiles, pad N up to a multiple of the tile.
    lane = 128
    batch_tile = max(lane, (batch_tile // lane) * lane)
    n_lane = pl.cdiv(N, lane) * lane
    batch_tile = min(batch_tile, n_lane)
    n_pad = pl.cdiv(N, batch_tile) * batch_tile

    xT = jnp.transpose(x).astype(compute_dtype)             # (ob_dim, N)
    if n_pad != N:
        xT = jnp.pad(xT, ((0, 0), (0, n_pad - N)))

    grid = (n_pad // batch_tile,)

    x_spec = pl.BlockSpec((ob_dim, batch_tile), lambda i: (0, i))
    param_specs = [pl.BlockSpec(p.shape, lambda i: (0, 0)) for p in packed]
    out_spec = pl.BlockSpec((1, batch_tile), lambda i: (0, i))

    # Advisory cost estimate for XLA's scheduler.
    two_s = int(packed[0].shape[0])
    p_out = int(packed[-2].shape[0])
    flops = 2 * n_pad * (ob_dim * two_s
                         + max(n_hidden - 1, 0) * two_s * two_s
                         + two_s * p_out)
    transcendentals = n_pad * two_s * n_hidden
    bytes_accessed = (int(xT.size) * int(xT.dtype.itemsize)
                      + n_pad * 4
                      + sum(int(p.size) * int(p.dtype.itemsize) for p in packed))

    out = pl.pallas_call(
        make_rnd_kernel(n_hidden),
        out_shape=jax.ShapeDtypeStruct((1, n_pad), jnp.float32),
        grid_spec=pltpu.PrefetchScalarGridSpec(
            num_scalar_prefetch=0,
            grid=grid,
            in_specs=[x_spec] + param_specs,
            out_specs=out_spec,
        ),
        compiler_params=pltpu.CompilerParams(
            dimension_semantics=("parallel",)),
        cost_estimate=pl.CostEstimate(
            flops=flops,
            transcendentals=transcendentals,
            bytes_accessed=bytes_accessed),
    )(xT, *packed)

    return out[0, :N]


# --------------------------------------------------------------------------
# Pure-JAX reference + parameter construction (mirrors RNDModel's two inits)
# --------------------------------------------------------------------------
def make_mlp_params(key, input_size, output_size, n_layers, size, init):
    """init: 'uniform' (init_method_1) or 'normal' (init_method_2)."""
    dims = [input_size] + [size] * n_layers + [output_size]
    params = []
    for i in range(len(dims) - 1):
        key, kw, kb = jax.random.split(key, 3)
        if init == "uniform":
            w = jax.random.uniform(kw, (dims[i], dims[i + 1]), jnp.float32)
            b = jax.random.uniform(kb, (1, dims[i + 1]), jnp.float32)
        else:
            w = jax.random.normal(kw, (dims[i], dims[i + 1]), jnp.float32)
            b = jax.random.normal(kb, (1, dims[i + 1]), jnp.float32)
        params.extend([w, b])
    return params


def rnd_reference(x, f_params, fhat_params):
    def mlp(h, p):
        n = len(p) // 2
        for i in range(n):
            w, b = p[2 * i], p[2 * i + 1]
            h = h @ w + b
            if i < n - 1:
                h = jnp.tanh(h)
        return h
    diff = mlp(x, f_params) - mlp(x, fhat_params)
    return jnp.sqrt(jnp.sum(diff * diff, axis=1))


# --------------------------------------------------------------------------
if __name__ == "__main__":
    # Hyperparams implied by RNDModel.__init__ (small synthetic values).
    ob_dim = 16
    rnd_output_size = 8
    rnd_n_layers = 2
    rnd_size = 32
    batch = 256            # multiple tiles with batch_tile=128 -> grid of 2

    key = jax.random.PRNGKey(0)
    kx, kf, kh = jax.random.split(key, 3)

    x = jax.random.normal(kx, (batch, ob_dim), jnp.float32)
    # f uses init_method_1 (uniform), f_hat uses init_method_2 (normal).
    f_params = make_mlp_params(kf, ob_dim, rnd_output_size, rnd_n_layers,
                               rnd_size, init="uniform")
    fhat_params = make_mlp_params(kh, ob_dim, rnd_output_size, rnd_n_layers,
                                  rnd_size, init="normal")

    ref = rnd_reference(x, f_params, fhat_params)

    # f32 path (tight check of the fused/packed math).
    err_f32 = rnd_forward(x, f_params, fhat_params,
                          batch_tile=128, use_bf16=False)
    err_f32 = jax.block_until_ready(err_f32)

    # bf16 MXU path (primary, perf-optimized; looser tolerance from rounding).
    err_bf16 = rnd_forward(x, f_params, fhat_params,
                           batch_tile=128, use_bf16=True)
    err_bf16 = jax.block_until_ready(err_bf16)

    assert err_bf16.shape == (batch,)
    assert jnp.allclose(err_f32, ref, atol=1e-3, rtol=1e-3)
    assert jnp.allclose(err_bf16, ref, atol=5e-2, rtol=5e-2)

    print("KERNEL_OK")
</pallas_src>

<mosaic_0001>
module attributes {stable_mosaic.version = 11 : i64} {
  func.func @kernel(%arg0: i32, %arg1: memref<16x128xf32, #tpu.memory_space<vmem>>, %arg2: memref<64x16xf32, #tpu.memory_space<vmem>>, %arg3: memref<64x1xf32, #tpu.memory_space<vmem>>, %arg4: memref<64x64xf32, #tpu.memory_space<vmem>>, %arg5: memref<64x1xf32, #tpu.memory_space<vmem>>, %arg6: memref<8x64xf32, #tpu.memory_space<vmem>>, %arg7: memref<8x1xf32, #tpu.memory_space<vmem>>, %arg8: memref<1x128xf32, #tpu.memory_space<vmem>>) attributes {dimension_semantics = [#tpu.dimension_semantics<parallel>], iteration_bounds = array<i64: 2>, scalar_prefetch = 0 : i64, scratch_operands = 0 : i64, tpu.core_type = #tpu.core_type<tc>, window_params = [{transform_indices = @transform_0, window_bounds = array<i64: 16, 128>}, {pipeline_mode = #tpu.pipeline_mode<synchronous>, transform_indices = @transform_1, window_bounds = array<i64: 64, 16>}, {pipeline_mode = #tpu.pipeline_mode<synchronous>, transform_indices = @transform_2, window_bounds = array<i64: 64, 1>}, {pipeline_mode = #tpu.pipeline_mode<synchronous>, transform_indices = @transform_3, window_bounds = array<i64: 64, 64>}, {pipeline_mode = #tpu.pipeline_mode<synchronous>, transform_indices = @transform_4, window_bounds = array<i64: 64, 1>}, {pipeline_mode = #tpu.pipeline_mode<synchronous>, transform_indices = @transform_5, window_bounds = array<i64: 8, 64>}, {pipeline_mode = #tpu.pipeline_mode<synchronous>, transform_indices = @transform_6, window_bounds = array<i64: 8, 1>}, {transform_indices = @transform_7, window_bounds = array<i64: 1, 128>}]} {
    %c0 = arith.constant 0 : index
    %c0_0 = arith.constant 0 : index
    %0 = vector.load %arg1[%c0, %c0_0] : memref<16x128xf32, #tpu.memory_space<vmem>>, vector<16x128xf32>
    %c0_1 = arith.constant 0 : index
    %c0_2 = arith.constant 0 : index
    %1 = vector.load %arg2[%c0_1, %c0_2] : memref<64x16xf32, #tpu.memory_space<vmem>>, vector<64x16xf32>
    %c0_3 = arith.constant 0 : index
    %c0_4 = arith.constant 0 : index
    %2 = vector.load %arg3[%c0_3, %c0_4] : memref<64x1xf32, #tpu.memory_space<vmem>>, vector<64x1xf32>
    %cst = arith.constant dense<0.000000e+00> : vector<64x128xf32>
    %3 = tpu.matmul %1, %0, %cst {dimension_numbers = #tpu.dot_dimension_numbers<[1], [0], [0], [1], [0, 0, 1, 1], [], []>} : vector<64x16xf32>, vector<16x128xf32>, vector<64x128xf32> -> vector<64x128xf32>
    %4 = vector.broadcast %2 : vector<64x1xf32> to vector<64x128xf32>
    %5 = arith.addf %3, %4 : vector<64x128xf32>
    %6 = math.tanh %5 : vector<64x128xf32>
    %c0_5 = arith.constant 0 : index
    %c0_6 = arith.constant 0 : index
    %7 = vector.load %arg4[%c0_5, %c0_6] : memref<64x64xf32, #tpu.memory_space<vmem>>, vector<64x64xf32>
    %c0_7 = arith.constant 0 : index
    %c0_8 = arith.constant 0 : index
    %8 = vector.load %arg5[%c0_7, %c0_8] : memref<64x1xf32, #tpu.memory_space<vmem>>, vector<64x1xf32>
    %cst_9 = arith.constant dense<0.000000e+00> : vector<64x128xf32>
    %9 = tpu.matmul %7, %6, %cst_9 {dimension_numbers = #tpu.dot_dimension_numbers<[1], [0], [0], [1], [0, 0, 1, 1], [], []>} : vector<64x64xf32>, vector<64x128xf32>, vector<64x128xf32> -> vector<64x128xf32>
    %10 = vector.broadcast %8 : vector<64x1xf32> to vector<64x128xf32>
    %11 = arith.addf %9, %10 : vector<64x128xf32>
    %12 = math.tanh %11 : vector<64x128xf32>
    %c0_10 = arith.constant 0 : index
    %c0_11 = arith.constant 0 : index
    %13 = vector.load %arg6[%c0_10, %c0_11] : memref<8x64xf32, #tpu.memory_space<vmem>>, vector<8x64xf32>
    %c0_12 = arith.constant 0 : index
    %c0_13 = arith.constant 0 : index
    %14 = vector.load %arg7[%c0_12, %c0_13] : memref<8x1xf32, #tpu.memory_space<vmem>>, vector<8x1xf32>
    %cst_14 = arith.constant dense<0.000000e+00> : vector<8x128xf32>
    %15 = tpu.matmul %13, %12, %cst_14 {dimension_numbers = #tpu.dot_dimension_numbers<[1], [0], [0], [1], [0, 0, 1, 1], [], []>} : vector<8x64xf32>, vector<64x128xf32>, vector<8x128xf32> -> vector<8x128xf32>
    %16 = vector.broadcast %14 : vector<8x1xf32> to vector<8x128xf32>
    %17 = arith.addf %15, %16 : vector<8x128xf32>
    %18 = arith.mulf %17, %17 : vector<8x128xf32>
    %cst_15 = arith.constant dense<0.000000e+00> : vector<128xf32>
    %19 = vector.multi_reduction <add>, %18, %cst_15 [0] : vector<8x128xf32> to vector<128xf32>
    %20 = vector.shape_cast %19 : vector<128xf32> to vector<1x128xf32>
    %21 = math.sqrt %20 : vector<1x128xf32>
    %c0_16 = arith.constant 0 : index
    %c0_17 = arith.constant 0 : index
    %22 = vector.load %arg8[%c0_16, %c0_17] : memref<1x128xf32, #tpu.memory_space<vmem>>, vector<1x128xf32>
    tpu.vector_store %arg8[%c0_16, %c0_17], %21 {strides = array<i32>} : memref<1x128xf32, #tpu.memory_space<vmem>>, vector<1x128xf32>,
    return
  }
  func.func @transform_0(%arg0: i32) -> (i32, i32) {
    %c0_i32 = arith.constant 0 : i32
    %c0_i32_0 = arith.constant 0 : i32
    return %c0_i32, %arg0 : i32, i32
  }
  func.func @transform_1(%arg0: i32) -> (i32, i32) {
    %c0_i32 = arith.constant 0 : i32
    %c0_i32_0 = arith.constant 0 : i32
    %c0_i32_1 = arith.constant 0 : i32
    return %c0_i32, %c0_i32_0 : i32, i32
  }
  func.func @transform_2(%arg0: i32) -> (i32, i32) {
    %c0_i32 = arith.constant 0 : i32
    %c0_i32_0 = arith.constant 0 : i32
    %c0_i32_1 = arith.constant 0 : i32
    return %c0_i32, %c0_i32_0 : i32, i32
  }
  func.func @transform_3(%arg0: i32) -> (i32, i32) {
    %c0_i32 = arith.constant 0 : i32
    %c0_i32_0 = arith.constant 0 : i32
    %c0_i32_1 = arith.constant 0 : i32
    return %c0_i32, %c0_i32_0 : i32, i32
  }
  func.func @transform_4(%arg0: i32) -> (i32, i32) {
    %c0_i32 = arith.constant 0 : i32
    %c0_i32_0 = arith.constant 0 : i32
    %c0_i32_1 = arith.constant 0 : i32
    return %c0_i32, %c0_i32_0 : i32, i32
  }
  func.func @transform_5(%arg0: i32) -> (i32, i32) {
    %c0_i32 = arith.constant 0 : i32
    %c0_i32_0 = arith.constant 0 : i32
    %c0_i32_1 = arith.constant 0 : i32
    return %c0_i32, %c0_i32_0 : i32, i32
  }
  func.func @transform_6(%arg0: i32) -> (i32, i32) {
    %c0_i32 = arith.constant 0 : i32
    %c0_i32_0 = arith.constant 0 : i32
    %c0_i32_1 = arith.constant 0 : i32
    return %c0_i32, %c0_i32_0 : i32, i32
  }
  func.func @transform_7(%arg0: i32) -> (i32, i32) {
    %c0_i32 = arith.constant 0 : i32
    %c0_i32_0 = arith.constant 0 : i32
    return %c0_i32, %arg0 : i32, i32
  }
}

</mosaic_0001>

<bundles_post_ra>
// kernel: tpu_custom_call.1
= control target key start
LH: loop header
LB: loop body
LE: loop exit
PB: predicated region body
PF: predicated region fallthrough
CT: control target
= control target key end

     0   :  { %12 = vsyncpa [#allocation4], 0  ;;  %s1447_s0 = inlined_call_operand.vmem [shape: f32[16,256], index: 0, kind: input, shape index: {}]   ;;  %s1448_s1 = inlined_call_operand.vmem [shape: f32[64,16], index: 1, kind: input, shape index: {}]   ;;  %s1449_s2 = inlined_call_operand.vmem [shape: f32[64,1], index: 2, kind: input, shape index: {}]   ;;  %s1450_s3 = inlined_call_operand.vmem [shape: f32[64,64], index: 3, kind: input, shape index: {}]   ;;  %s1451_s4 = inlined_call_operand.vmem [shape: f32[64,1], index: 4, kind: input, shape index: {}]   ;;  %s1452_s5 = inlined_call_operand.vmem [shape: f32[8,64], index: 5, kind: input, shape index: {}]   ;;  %s1453_s6 = inlined_call_operand.vmem [shape: f32[8,1], index: 6, kind: input, shape index: {}]   ;;  %s1454_s7 = inlined_call_operand.hbm [shape: f32[1,256], index: 7, kind: output, shape index: {}]  }
   0x1   :  { %14 = vsyncpa [#allocation4 + $0x1], 0  ;;  %s1218_s24 = smov 0   ;;  %s1220_s25 = smov 0  }
   0x2   :  { %s1222_s26 = smov 0   ;;  %s1224_s27 = smov 0  }
   0x3 LB: > { %s872_s28 = sadd.s32 4294967295, %s1171_s27   ;;  %s873_s29 = sadd.s32 4294967294, %s1171_s27   ;;  %s1171_s27 = sphi %s1224_s27, %s1460_s27   ;;  %s1167_s26 = sphi %s1222_s26, %s1459_s26   ;;  %s1163_s25 = sphi %s1220_s25, %s1458_s25   ;;  %s1159_s24 = sphi %s1218_s24, %s1457_s24  }
   0x4   : > { %s1241_s30 = sadd.s32 1, %s1171_s27   ;;  %s27_s8 = sadd.s32 1, %s1167_s26 }
   0x5   : > { %s24_s9 = ssub.s32 %s1171_s27, %s1241_s30  ;;  %p34_p0 = scmp.ne.s32.totalorder %s1167_s26, %s1163_s25 }
   0x6   : > { %p25_p1 = scmp.eq.s32.totalorder %s24_s9, 0  ;;  %p35_p2 = scmp.eq.s32.totalorder %s1171_s27, 0 }
   0x7   : > { %p190_p3 = scmp.eq.s32.totalorder %s872_s28, 1  ;;  %p195_p4 = scmp.ne.s32.totalorder %s1163_s25, %s1159_s24 }
   0x8   : > { %s1254_s10 = scalar_select %p25_p1, %s1167_s26, %s27_s8  }
   0x9   : > { %p36_p5 = por %p35_p2, %p34_p0  ;;  %p1256_p6 = por %p190_p3, %p34_p0 }
   0xa   : > { %p196_p7 = scmp.eq.s32.totalorder %s873_s29, 1  ;;  %p875_p9 = scmp.ge.s32.totalorder %s1171_s27, 2 }
   0xc   : > { %p1260_p8 = por %p196_p7, %p195_p4  ;;  %230 = sbr.rel (%p875_p9) target bundleno = 26 (0x1a), region = 40 }
  0x13   : > { %233 = sbr.rel (!%p36_p5) target bundleno = 26 (0x1a), region = 44  ;;  %s235_s13 = sand.u32 (%p36_p5), 1, %s1167_s26  }
  0x14   : > { %s877_s14 = sshll.u32 (%p36_p5), %s1171_s27, 3  ;;  %s876_s15 = sshll.u32 (%p36_p5), %s235_s13, 4 }
  0x15   : > { %s239_s18 = scalar_lea.vmem (%p36_p5), %s1447_s0, %s877_s14  ;;  %s237_s19 = scalar_lea.vmem (%p36_p5), [#allocation2], %s876_s15 }
  0x16   : > { %v269_v0 = vld [vmem:[%s239_s18] sm:$0xff] (%p36_p5)  ;;  %v271_v1 = vld [vmem:[%s239_s18 + $0x10] sm:$0xff] (%p36_p5) }
  0x17   : > { %270 = vst [vmem:[%s237_s19] sm:$0xff] (%p36_p5), %v269_v0  ;;  %272 = vst [vmem:[%s237_s19 + $0x8] sm:$0xff] (%p36_p5), %v271_v1 }
  0x1a PF: > { %p878_p10 = scmp.ge.s32.totalorder %s1171_s27, 1  ;;  %p277_p11 = scmp.lt.s32.totalorder %s1171_s27, 3 }
  0x1c   : > { %p278_p12 = pnand %p878_p10, %p277_p11 }
  0x1d   : > { %s1275_s20 = sand.u32 (!%p278_p12), 1, %s1163_s25   ;;  %v316_v2 = vld [vmem:[%s1448_s1] sm:$0xff] (!%p278_p12)  ;;  %vm372_vm0 = vcmask (!%p278_p12), 130048   ;;  %v1173_v3 = vmov (!%p278_p12), 0   ;;  %v325_v8 = vld [vmem:[%s1449_s2 + $0x8] sm:$0xff] (!%p278_p12)  ;;  %v326_v9 = vld [vmem:[%s1449_s2 + $0x10] sm:$0xff] (!%p278_p12) }
  0x1e   : > { %281 = sbr.rel (%p278_p12) target bundleno = 783 (0x30f), region = 82  ;;  %s879_s23 = sshll.u32 (!%p278_p12), %s1275_s20, 4  ;;  %939 = vmatprep.mubr.msk.f32.mxu0 (!%p278_p12), %vm372_vm0, %v316_v2  ;;  %1073 = vset.pattern.permute.xlu0 (!%p278_p12), %v1173_v3  ;;  %v324_v4 = vld [vmem:[%s1449_s2] sm:$0xff] (!%p278_p12)  ;;  %v327_v10 = vld [vmem:[%s1449_s2 + $0x18] sm:$0xff] (!%p278_p12)  ;;  %v317_v11 = vld [vmem:[%s1448_s1 + $0x8] sm:$0xff] (!%p278_p12)  ;;  %vm566_vm1 = vcmask (!%p278_p12), 523264  }
  0x1f   : > { %1074 = vset.pattern.permute.xlu1 (!%p278_p12), %v1173_v3  ;;  %s286_s9 = scalar_lea.vmem (!%p278_p12), [#allocation2], %s879_s23  ;;  %334 = vperm.xlu0 (!%p278_p12), %1073, %v324_v4   ;;  %v318_v12 = vld [vmem:[%s1448_s1 + $0x10] sm:$0xff] (!%p278_p12)  ;;  %v328_v13 = vld [vmem:[%s1449_s2 + $0x20] sm:$0xff] (!%p278_p12)  ;;  %v329_v14 = vld [vmem:[%s1449_s2 + $0x28] sm:$0xff] (!%p278_p12)  ;;  %vm1175_vm2 = vmmov (!%p278_p12), 0   ;;  %s313_s13 = scalar_lea.vmem (!%p278_p12), [#allocation3], %s1275_s20 }
  0x20   : > { %v314_v5 = vld [vmem:[%s286_s9] sm:$0xff] (!%p278_p12)  ;;  %v315_v6 = vld [vmem:[%s286_s9 + $0x8] sm:$0xff] (!%p278_p12)  ;;  %344 = vperm.xlu1 (!%p278_p12), %1074, %v326_v9   ;;  %s897_s9 = sshll.u32 (!%p278_p12), %s872_s28, 4  ;;  %s812_s14 = sshll.u32 (!%p278_p12), %s313_s13, 4  ;;  %s1405_s14 = int_to_ptr.vmem [resolvable:$true] %s812_s14 }
  0x21   : > { %v998_v7 = vpack.c.bf16 (!%p278_p12), %v315_v6, %v314_v5  ;;  %v319_v15 = vld [vmem:[%s1448_s1 + $0x18] sm:$0xff] (!%p278_p12)  ;;  %v320_v16 = vld [vmem:[%s1448_s1 + $0x20] sm:$0xff] (!%p278_p12)  ;;  %v330_v17 = vld [vmem:[%s1449_s2 + $0x30] sm:$0xff] (!%p278_p12)  ;;  %s1403_s17 = scalar_lea.hbm (!%p278_p12), %s1454_s7, %s897_s9  ;;  %s800_s28 = scalar_lea.sflag (!%p278_p12), [#allocation4], %s1275_s20 }
  0x22   : > { %v331_v18 = vld [vmem:[%s1449_s2 + $0x38] sm:$0xff] (!%p278_p12)  ;;  %v321_v19 = vld [vmem:[%s1448_s1 + $0x28] sm:$0xff] (!%p278_p12)  ;;  %v322_v20 = vld [vmem:[%s1448_s1 + $0x30] sm:$0xff] (!%p278_p12)  ;;  %s1109_s18 = scalar_lea.vmem (!%p278_p12), %s1405_s14, 16  ;;  %s1177_s19 = smov (!%p278_p12), [#allocation3]  }
  0x23   : > { %999 = vmatprep.subr.bf16.mxu0 (!%p278_p12), %v998_v7  ;;  %339 = vperm.xlu0 (!%p278_p12), %1073, %v325_v8   ;;  %v518_v21 = vld [vmem:[%s1451_s4] sm:$0xff] (!%p278_p12)  ;;  %v519_v22 = vld [vmem:[%s1451_s4 + $0x8] sm:$0xff] (!%p278_p12)  ;;  %v323_v23 = vld [vmem:[%s1448_s1 + $0x38] sm:$0xff] (!%p278_p12)  ;;  %p1110_p13 = scmp.ne.s32.totalorder (!%p278_p12), %s1405_s14, %s1109_s18  ;;  %s1113_s21 = sshll.u32 (!%p278_p12), %s1177_s19, 4  ;;  %s1114_s21 = int_to_ptr.vmem [resolvable:$false] %s1113_s21 }
  0x24   : > { %1001 = vmatpush3.bf16.msra.mxu0 (!%p278_p12), %v998_v7  ;;  %349 = vperm.xlu1 (!%p278_p12), %1074, %v327_v10   ;;  %v520_v24 = vld [vmem:[%s1451_s4 + $0x10] sm:$0xff] (!%p278_p12)  ;;  %v521_v25 = vld [vmem:[%s1451_s4 + $0x18] sm:$0xff] (!%p278_p12)  ;;  %v522_v26 = vld [vmem:[%s1451_s4 + $0x20] sm:$0xff] (!%p278_p12)  ;;  %s1115_s22 = scalar_lea.vmem (!%p278_p12), %s1114_s21, 32  ;;  %p1116_p2 = scmp.lt.s32.totalorder (!%p278_p12), %s1405_s14, %s1114_s21 }
  0x25   : > { %v523_v27 = vld [vmem:[%s1451_s4 + $0x28] sm:$0xff]  ;;  %v524_v28 = vld [vmem:[%s1451_s4 + $0x30] sm:$0xff]  ;;  %v525_v29 = vld [vmem:[%s1451_s4 + $0x38] sm:$0xff]  ;;  %p1111_p0 = pnand %p1110_p13, %p1256_p6  ;;  %p1117_p3 = scmp.lt.s32.totalorder %s1115_s22, %s1109_s18 }
  0x26   : > { %v705_v30 = vld [vmem:[%s1453_s6] sm:$0xff]  ;;  %v511_v4 = vld [vmem:[%s1450_s3 + $0x8] sm:$0xff]  ;;  %v512_v5 = vld [vmem:[%s1450_s3 + $0x10] sm:$0xff] }
  0x27   : > { %940 = vmatmul.mubr.msk.f32.vlgmr.msra.gmra.mrb[0].mxu0 %vm372_vm0, %v317_v11  ;;  %354 = vperm.xlu0 %1073, %v328_v13   ;;  %v510_v31 = vld [vmem:[%s1450_s3] sm:$0xff]  ;;  %v513_v6 = vld [vmem:[%s1450_s3 + $0x18] sm:$0xff]  ;;  %v515_v8 = vld [vmem:[%s1450_s3 + $0x28] sm:$0xff]  ;;  %v1174_v11 = vmov 0.0|0.0   ;;  %p1112_p1 = pneg %p1111_p0  ;;  %p1118_p4 = por %p1117_p3, %p1116_p2 }
  0x28   : > { %942 = vmatprep.mubr.msk.f32.mxu0 %vm372_vm0, %v318_v12  ;;  %359 = vperm.xlu1 %1074, %v329_v14   ;;  %v514_v7 = vld [vmem:[%s1450_s3 + $0x20] sm:$0xff]  ;;  %v516_v9 = vld [vmem:[%s1450_s3 + $0x30] sm:$0xff]  ;;  %v517_v10 = vld [vmem:[%s1450_s3 + $0x38] sm:$0xff]  ;;  %v1176_v12 = vmov 0.0  }
  0x29   : > { %967 = vmatprep.mubr.msk.f32.mxu1 %vm566_vm1, %v510_v31  ;;  %1018 = vmatprep.subr.bf16.mxu0 %v1174_v11  ;;  %p1119_p5 = pnand %p1118_p4, %p1112_p1 }
  0x2b   : > { %943 = vmatmul.mubr.msk.f32.gmra.mrb[2].mxu0 %vm372_vm0, %v319_v15  ;;  %364 = vperm.xlu0 %1073, %v330_v17  }
  0x2c   : > { %945 = vmatprep.mubr.msk.f32.mxu0 %vm372_vm0, %v320_v16  ;;  %369 = vperm.xlu1 %1074, %v331_v18  }
  0x2f   : > { %946 = vmatmul.mubr.msk.f32.gmra.mrb[4].mxu0 %vm372_vm0, %v321_v19  ;;  %528 = vperm.xlu0 %1073, %v518_v21  }
  0x30   : > { %948 = vmatprep.mubr.msk.f32.mxu0 %vm372_vm0, %v322_v20  ;;  %533 = vperm.xlu1 %1074, %v519_v22  }
  0x33   : > { %949 = vmatmul.mubr.msk.f32.gmra.mrb[6].mxu0 %vm372_vm0, %v323_v23  ;;  %538 = vperm.xlu0 %1073, %v520_v24  }
  0x34   : > { %543 = vperm.xlu1 %1074, %v521_v25   ;;  %995 = vmatprep.mubr.msk.f32.mxu0 %vm1175_vm2, %v1176_v12 }
  0x37   : > { %548 = vperm.xlu0 %1073, %v522_v26  }
  0x38   : > { %553 = vperm.xlu1 %1074, %v523_v27  }
  0x3b   : > { %558 = vperm.xlu0 %1073, %v524_v28  }
  0x3c   : > { %563 = vperm.xlu1 %1074, %v525_v29  }
  0x3f   : > { %708 = vperm.xlu0 %1073, %v705_v30  }
  0x9e   : > { %v335_v32 = vpop.permute.xlu0 %334 }
  0x9f   : > { %v345_v33 = vpop.permute.xlu1 %344 }
  0xa2   : > { %v340_v34 = vpop.permute.xlu0 %339 }
  0xa3   : > { %v350_v35 = vpop.permute.xlu1 %349 }
  0xa6   : > { %v355_v45 = vpop.permute.xlu0 %354 }
  0xa7   : > { %v360_v43 = vpop.permute.xlu1 %359 }
  0xaa   : > { %v365_v53 = vpop.permute.xlu0 %364 }
  0xab   : > { %v370_v50 = vpop.permute.xlu1 %369 }
  0xae   : > { %v529_v14 = vpop.permute.xlu0 %528 }
  0xaf   : > { %v534_v13 = vpop.permute.xlu1 %533 }
  0xb2   : > { %v539_v17 = vpop.permute.xlu0 %538 }
  0xb3   : > { %v544_v15 = vpop.permute.xlu1 %543 }
  0xb6   : > { %v549_v26 = vpop.permute.xlu0 %548 }
  0xb7   : > { %v554_v24 = vpop.permute.xlu1 %553 }
  0xbb   : > { %v564_v31 = vpop.permute.xlu1 %563 }
  0xfa   : > { %v941_v36 = vpop.f32.mrb[0].mxu0 }
  0xfb   : > { %v469_v37 = vadd.f32 %v941_v36, %v340_v34  ;;  %v463_v38 = vpop.f32.mrb[1].mxu0  ;;  %v559_v34 = vpop.permute.xlu0 %558 }
  0xfc   : > { %v464_v39 = vadd.f32 %v463_v38, %v335_v32 }
  0xfd   : > { %1075 = vtanh.f32 %v469_v37 }
  0xfe   : > { %1077 = vtanh.f32 %v464_v39  ;;  %v944_v40 = vpop.f32.mrb[2].mxu0 }
  0xff   : > { %v479_v41 = vadd.f32 %v944_v40, %v350_v35  ;;  %v473_v42 = vpop.f32.mrb[3].mxu0 }
 0x100   : > { %v474_v44 = vadd.f32 %v473_v42, %v345_v33 }
 0x101   : > { %1079 = vtanh.f32 %v479_v41 }
 0x102   : > { %1081 = vtanh.f32 %v474_v44  ;;  %v947_v46 = vpop.f32.mrb[4].mxu0 }
 0x103   : > { %v489_v47 = vadd.f32 %v947_v46, %v360_v43  ;;  %v483_v48 = vpop.f32.mrb[5].mxu0 }
 0x104   : > { %v484_v49 = vadd.f32 %v483_v48, %v355_v45 }
 0x105   : > { %1083 = vtanh.f32 %v489_v47 }
 0x106   : > { %1085 = vtanh.f32 %v484_v49  ;;  %v950_v51 = vpop.f32.mrb[6].mxu0  ;;  %v704_v49 = vld [vmem:[%s1452_s5] sm:$0xff] }
 0x107   : > { %v1076_v52 = vpop.eup %1075  ;;  %v499_v54 = vadd.f32 %v950_v51, %v370_v50  ;;  %v493_v55 = vpop.f32.mrb[7].mxu0 }
 0x108   : > { %v1078_v56 = vpop.eup %1077  ;;  %v494_v57 = vadd.f32 %v493_v55, %v365_v53  ;;  %v709_v50 = vpop.permute.xlu0 %708 }
 0x109   : > { %1087 = vtanh.f32 %v499_v54  ;;  %v1002_v58 = vpack.c.bf16 %v1076_v52, %v1078_v56 }
 0x10a   : > { %1089 = vtanh.f32 %v494_v57 }
 0x10b   : > { %v1080_v59 = vpop.eup %1079  ;;  %1003 = vmatprep.subr.bf16.mxu1 %v1002_v58 }
 0x10c   : > { %v1082_v60 = vpop.eup %1081  ;;  %1005 = vmatpush3.bf16.msra.mxu1 %v1002_v58 }
 0x10d   : > { %v1006_v61 = vpack.c.bf16 %v1080_v59, %v1082_v60 }
 0x10f   : > { %v1084_v62 = vpop.eup %1083  ;;  %1007 = vmatprep.subr.bf16.mxu1 %v1006_v61 }
 0x110   : > { %v1086_v63 = vpop.eup %1085  ;;  %1009 = vmatpush3.bf16.msra.mxu1 %v1006_v61 }
 0x111   : > { %v1010_v0 = vpack.c.bf16 %v1084_v62, %v1086_v63 }
 0x113   : > { %v1088_v1 = vpop.eup %1087  ;;  %1011 = vmatprep.subr.bf16.mxu1 %v1010_v0 }
 0x114   : > { %v1090_v2 = vpop.eup %1089  ;;  %1013 = vmatpush3.bf16.msra.mxu1 %v1010_v0 }
 0x115   : > { %v1014_v3 = vpack.c.bf16 %v1088_v1, %v1090_v2 }
 0x117   : > { %1015 = vmatprep.subr.bf16.mxu1 %v1014_v3 }
 0x118   : > { %1017 = vmatpush3.bf16.msra.mxu1 %v1014_v3 }
 0x11b   : > { %968 = vmatmul.mubr.msk.f32.vlgmr.msra.gmra.mrb[0].mxu1 %vm566_vm1, %v511_v4 }
 0x11c   : > { %970 = vmatprep.mubr.msk.f32.mxu1 %vm566_vm1, %v512_v5 }
 0x11f   : > { %971 = vmatmul.mubr.msk.f32.gmra.mrb[2].mxu1 %vm566_vm1, %v513_v6 }
 0x120   : > { %973 = vmatprep.mubr.msk.f32.mxu1 %vm566_vm1, %v514_v7 }
 0x123   : > { %974 = vmatmul.mubr.msk.f32.gmra.mrb[4].mxu1 %vm566_vm1, %v515_v8 }
 0x124   : > { %976 = vmatprep.mubr.msk.f32.mxu1 %vm566_vm1, %v516_v9 }
 0x127   : > { %977 = vmatmul.mubr.msk.f32.gmra.mrb[6].mxu1 %vm566_vm1, %v517_v10 }
 0x1ee   : > { %v969_v16 = vpop.f32.mrb[0].mxu1 }
 0x1ef   : > { %v663_v18 = vadd.f32 %v969_v16, %v534_v13  ;;  %v657_v19 = vpop.f32.mrb[1].mxu1 }
 0x1f0   : > { %v658_v20 = vadd.f32 %v657_v19, %v529_v14 }
 0x1f1   : > { %1091 = vtanh.f32 %v663_v18 }
 0x1f2   : > { %1093 = vtanh.f32 %v658_v20  ;;  %v972_v21 = vpop.f32.mrb[2].mxu1 }
 0x1f3   : > { %v673_v22 = vadd.f32 %v972_v21, %v544_v15  ;;  %v667_v23 = vpop.f32.mrb[3].mxu1 }
 0x1f4   : > { %v668_v25 = vadd.f32 %v667_v23, %v539_v17 }
 0x1f5   : > { %1095 = vtanh.f32 %v673_v22 }
 0x1f6   : > { %1097 = vtanh.f32 %v668_v25  ;;  %v975_v27 = vpop.f32.mrb[4].mxu1 }
 0x1f7   : > { %v683_v28 = vadd.f32 %v975_v27, %v554_v24  ;;  %v677_v29 = vpop.f32.mrb[5].mxu1 }
 0x1f8   : > { %v678_v30 = vadd.f32 %v677_v29, %v549_v26 }
 0x1f9   : > { %1099 = vtanh.f32 %v683_v28 }
 0x1fa   : > { %1101 = vtanh.f32 %v678_v30  ;;  %v978_v32 = vpop.f32.mrb[6].mxu1 }
 0x1fb   : > { %v1092_v33 = vpop.eup %1091  ;;  %v693_v35 = vadd.f32 %v978_v32, %v564_v31  ;;  %v687_v36 = vpop.f32.mrb[7].mxu1 }
 0x1fc   : > { %v1094_v37 = vpop.eup %1093  ;;  %v688_v38 = vadd.f32 %v687_v36, %v559_v34 }
 0x1fd   : > { %1103 = vtanh.f32 %v693_v35  ;;  %v1019_v39 = vpack.c.bf16 %v1092_v33, %v1094_v37 }
 0x1fe   : > { %1105 = vtanh.f32 %v688_v38 }
 0x1ff   : > { %v1096_v40 = vpop.eup %1095  ;;  %1020 = vmatpush3.bf16.msra.mxu0 %v1019_v39 }
 0x200   : > { %v1098_v41 = vpop.eup %1097  ;;  %1021 = vmatprep.subr.bf16.mxu0 %v1174_v11 }
 0x201   : > { %v1022_v42 = vpack.c.bf16 %v1096_v40, %v1098_v41 }
 0x203   : > { %v1100_v43 = vpop.eup %1099  ;;  %1023 = vmatpush3.bf16.msra.mxu0 %v1022_v42 }
 0x204   : > { %v1102_v44 = vpop.eup %1101  ;;  %1024 = vmatprep.subr.bf16.mxu0 %v1174_v11 }
 0x205   : > { %v1025_v45 = vpack.c.bf16 %v1100_v43, %v1102_v44 }
 0x207   : > { %v1104_v46 = vpop.eup %1103  ;;  %1026 = vmatpush3.bf16.msra.mxu0 %v1025_v45 }
 0x208   : > { %v1106_v47 = vpop.eup %1105  ;;  %1027 = vmatprep.subr.bf16.mxu0 %v1174_v11 }
 0x209   : > { %v1028_v48 = vpack.c.bf16 %v1104_v46, %v1106_v47 }
 0x20b   : > { %1029 = vmatpush3.bf16.msra.mxu0 %v1028_v48 }
 0x20e   : > { %996 = vmatmul.mubr.msk.f32.vlgmr.msra.gmra.mrb[8].mxu0 %vm566_vm1, %v704_v49 }
 0x2e1   : > { %v780_v51 = vpop.f32.mrb[8].mxu0 }
 0x2e2   : > { %v781_v52 = vadd.f32 %v780_v51, %v709_v50  ;;  %v997_v53 = vpop.f32.mrb[9].mxu0 }
 0x2e4   : > { %v784_v54 = vmul.f32 %v781_v52, %v781_v52 }
 0x2e6   : > { %v785_v55 = vrot.slane %v784_v54, 4 }
 0x2e8   : > { %v786_v56 = vadd.f32 %v785_v55, %v784_v54 }
 0x2ea   : > { %v787_v57 = vrot.slane %v786_v56, 2 }
 0x2ec   : > { %v788_v58 = vadd.f32 %v787_v57, %v786_v56 }
 0x2ee   : > { %v789_v59 = vrot.slane %v788_v58, 1 }
 0x2f0   : > { %v790_v60 = vadd.f32 %v789_v59, %v788_v58 }
 0x2f2   : > { %1107 = vrsqrt.f32 %v790_v60  ;;  %vm793_vm3 = vcmp.eq.f32.partialorder %v790_v60, inf  ;;  %v796_v63 = vand.u32 2147483648, %v790_v60  ;;  %vm795_vm4 = vcmp.eq.f32.partialorder %v790_v60, 0.0 }
 0x2fc   : > { %v1108_v61 = vpop.eup %1107 }
 0x2fd   : > { %v792_v62 = vmul.f32 %v1108_v61, %v790_v60 }
 0x2ff   : > { %v794_v0 = vsel %vm793_vm3, %v790_v60, %v792_v62 }
 0x300   : > { %v797_v1 = vsel %vm795_vm4, %v796_v63, %v794_v0 }
 0x301   : > { %798 = vst [vmem:[%s313_s13] sm:$0x1] %v797_v1 }
 0x302   : > { %1122 = shalt.err (!%p1119_p5)
}
 0x303   : > { %s1123_s20 = scalar_lea.hbm %s1403_s17, 16  ;;  %s1127_s8 = scalar_lea.hbm %s1454_s7, 32 }
 0x304   : > { %p1124_p7 = scmp.ne.s32.totalorder %s1403_s17, %s1123_s20  ;;  %p1128_p12 = scmp.lt.u32.totalorder %s1403_s17, %s1454_s7 }
 0x305   : > { %p1129_p13 = scmp.lt.u32.totalorder %s1127_s8, %s1123_s20  ;;  %p1131_p1 = scmp.lt.u32.totalorder %s1123_s20, %s1403_s17 }
 0x306   : > { %p1125_p10 = pnand %p1124_p7, %p1256_p6 }
 0x307   : > { %p1130_p0 = por %p1129_p13, %p1128_p12 }
 0x308   : > { %p1126_p11 = pneg %p1125_p10 }
 0x309   : > { %p1132_p2 = por %p1131_p1, %p1130_p0 }
 0x30b   : > { %p1133_p3 = pnand %p1132_p2, %p1126_p11 }
 0x30d   : > { %1136 = shalt.err (!%p1133_p3)
}
 0x30e   : > { %1030 = dma.vmem_to_hbm [thread:$0]  (%p1256_p6), %s1405_s14, 16, %s1403_s17, %s800_s28  }
 0x30f PF: > { %s824_s15 = sand.u32 1, %s1159_s24   ;;  %p1033_p4 = pnand %p875_p9, %p1260_p8 }
 0x310   : > { %s825_s16 = scalar_lea.sflag [#allocation4], %s824_s15 }
 0x311   : > { %1154 = dma.done.wait (!%p1033_p4), %s825_s16, 16  }
 0x312   : > { %1156 = vsyncadd (!%p1033_p4), %s825_s16, 4294967280  ;;  %p17_p5 = scmp.ge.s32.totalorder %s1241_s30, 4   ;;  %s1457_s24 = smov %s1163_s25 }
 0x313   : > { %s1458_s25 = smov %s1167_s26  ;;  %s1459_s26 = smov %s1254_s10 }
 0x314   : > { %s1460_s27 = smov %s1241_s30  ;;  %19 = sbr.rel (!%p17_p5) target bundleno = 3 (0x3), region = 126 }
 0x31b   :  { %829 = vsyncpa [#allocation4], 1 }
 0x31c   :  { %831 = vsyncpa [#allocation4 + $0x1], 1 }

</bundles_post_ra>
